<compile_context>
chip_gen: v6e
topology: v6e:2x2x1
jax: 0.10.0
libtpu: 0.0.40
codegen_flags: <defaults>
</compile_context>

<pallas_src>
import math
import functools

import jax
import jax.numpy as jnp
from jax import lax
from jax.experimental import pallas as pl
from jax.experimental.pallas import tpu as pltpu


def _layer_norm_f32(x, eps=1e-5):
    # nn.LayerNorm(d_model) freshly constructed in forward -> gamma=1, beta=0,
    # biased variance.  rsqrt goes to the otherwise-idle EUP slot.
    mean = jnp.mean(x, axis=-1, keepdims=True)
    c = x - mean
    var = jnp.mean(c * c, axis=-1, keepdims=True)
    return c * lax.rsqrt(var + eps)


def encoder_layer_kernel(x_ref, bias_ref, wq_ref, wk_ref, wv_ref, wo_ref,
                         w1_ref, w2_ref, out_ref, *attn_refs):
    """One batch element per grid step.

    x_ref    : (1, S, D)  f32   activations (f32 for the residual path)
    bias_ref : (1, S, S)  bf16  additive attention-mask bias (0 / -1e9)
    wq/wk    : (H, D, dk) bf16
    wv_ref   : (H, D, dv) bf16
    wo_ref   : (H, dv, D) bf16
    w1_ref   : (D, d_ff)  bf16
    w2_ref   : (d_ff, D)  bf16
    out_ref  : (1, S, D)  f32
    attn_refs: optionally one (1, H, S, S) f32 ref for the attention probs.
    """
    H, _, d_k = wq_ref.shape
    x32 = x_ref[0]                                # (S, D) f32 residual
    xb = x32.astype(jnp.bfloat16)                 # bf16 MXU operand
    bias = bias_ref[0].astype(jnp.float32)        # (S, S)

    # Head-batched Q/K/V projections: (H, S, D) x (H, D, dk|dv) -> (H, S, dk|dv).
    # Broadcasting x along the (major) head axis is cheap and avoids lane-offset
    # slicing of a packed (S, H*dk) projection.
    xh = jnp.broadcast_to(xb, (H,) + xb.shape)    # (H, S, D) bf16
    bmm = (((2,), (1,)), ((0,), (0,)))            # hsd,hdk->hsk
    q = lax.dot_general(xh, wq_ref[...], bmm, preferred_element_type=jnp.float32)
    k = lax.dot_general(xh, wk_ref[...], bmm, preferred_element_type=jnp.float32)
    v = lax.dot_general(xh, wv_ref[...], bmm,
                        preferred_element_type=jnp.float32).astype(jnp.bfloat16)

    # scores[h, q, s] = <q, k> / sqrt(dk) + mask_bias     (hqd,hkd->hqk)
    scores = lax.dot_general(q.astype(jnp.bfloat16), k.astype(jnp.bfloat16),
                             (((2,), (2,)), ((0,), (0,))),
                             preferred_element_type=jnp.float32)
    scores = scores * jnp.float32(1.0 / math.sqrt(d_k)) + bias[None, :, :]

    # Softmax over keys (f32 math, EUP approximate reciprocal).
    m = jnp.max(scores, axis=-1, keepdims=True)
    e = jnp.exp(scores - m)
    attn = e * pl.reciprocal(jnp.sum(e, axis=-1, keepdims=True), approx=True)

    if attn_refs:   # static Python check: attention-probs output requested
        attn_refs[0][0] = attn.astype(attn_refs[0].dtype)

    # context (hqk,hkd->hqd); output projection folded per head:
    # sum_h ctx[h] @ W_O[h] == concat-heads @ W_O  (no concatenate / transpose).
    ctx = lax.dot_general(attn.astype(jnp.bfloat16), v,
                          (((2,), (1,)), ((0,), (0,))),
                          preferred_element_type=jnp.float32)        # (H, S, dv)
    mha_h = lax.dot_general(ctx.astype(jnp.bfloat16), wo_ref[...],
                            (((2,), (1,)), ((0,), (0,))),
                            preferred_element_type=jnp.float32)      # (H, S, D)
    y = _layer_norm_f32(jnp.sum(mha_h, axis=0) + x32)                # residual + LN

    # Position-wise FFN: Linear -> ReLU -> Linear, residual + LN.
    h1 = jnp.maximum(jnp.dot(y.astype(jnp.bfloat16), w1_ref[...],
                             preferred_element_type=jnp.float32), 0.0)
    ffn = jnp.dot(h1.astype(jnp.bfloat16), w2_ref[...],
                  preferred_element_type=jnp.float32)
    out_ref[0] = _layer_norm_f32(ffn + y).astype(out_ref.dtype)


def encoder_layer(x, attn_mask, params, *, n_heads, d_k, d_v, return_attn=True):
    B, S, D = x.shape
    wq, wk, wv, wo, w1, w2 = params
    d_ff = w1.shape[1]
    bf16 = jnp.bfloat16

    # bf16 weights at the boundary (f32 accumulation inside the kernel),
    # pre-split per head so the kernel never slices lanes at d_k offsets.
    wq_h = wq.reshape(D, n_heads, d_k).transpose(1, 0, 2).astype(bf16)   # (H, D, dk)
    wk_h = wk.reshape(D, n_heads, d_k).transpose(1, 0, 2).astype(bf16)   # (H, D, dk)
    wv_h = wv.reshape(D, n_heads, d_v).transpose(1, 0, 2).astype(bf16)   # (H, D, dv)
    wo_h = wo.reshape(n_heads, d_v, D).astype(bf16)                      # (H, dv, D)
    w1b = w1.astype(bf16)
    w2b = w2.astype(bf16)
    # Additive mask bias, hoisted out of the per-head math, stored bf16.
    bias = (attn_mask.astype(jnp.float32) * jnp.float32(-1e9)).astype(bf16)
    x32 = x.astype(jnp.float32)

    def rep(shape):  # whole-array block, same block every grid step (weights)
        return pl.BlockSpec(shape, lambda b: (0,) * len(shape))

    out_shapes = [jax.ShapeDtypeStruct((B, S, D), jnp.float32)]
    out_specs = [pl.BlockSpec((1, S, D), lambda b: (b, 0, 0))]
    if return_attn:
        out_shapes.append(jax.ShapeDtypeStruct((B, n_heads, S, S), jnp.float32))
        out_specs.append(pl.BlockSpec((1, n_heads, S, S), lambda b: (b, 0, 0, 0)))

    results = pl.pallas_call(
        encoder_layer_kernel,
        out_shape=tuple(out_shapes),
        grid=(B,),
        in_specs=[
            pl.BlockSpec((1, S, D), lambda b: (b, 0, 0)),     # x (f32 residual)
            pl.BlockSpec((1, S, S), lambda b: (b, 0, 0)),     # mask bias (bf16)
            rep((n_heads, D, d_k)),                           # W_Q
            rep((n_heads, D, d_k)),                           # W_K
            rep((n_heads, D, d_v)),                           # W_V
            rep((n_heads, d_v, D)),                           # fc (W_O)
            rep((D, d_ff)),                                   # FFN W1
            rep((d_ff, D)),                                   # FFN W2
        ],
        out_specs=tuple(out_specs),
        compiler_params=pltpu.CompilerParams(
            # B >= 2 -> both v7x TensorCores get a block.
            dimension_semantics=("parallel",),
            # Toy shapes are tiny; keep the scoped budget well under v7x's 64 MiB.
            vmem_limit_bytes=32 * 1024 * 1024,
        ),
    )(x32, bias, wq_h, wk_h, wv_h, wo_h, w1b, w2b)
    # NOTE: for production S / d_ff, add flash-style seq and d_ff grid axes with
    # VMEM accumulator scratch so the working set also fits v7x's 64 MiB VMEM.

    if return_attn:
        return results[0], results[1]
    return results[0]


def reference_encoder_layer(x, attn_mask, params, *, n_heads, d_k, d_v):
    """Plain-JAX f32 reference matching the PyTorch forward semantics."""
    wq, wk, wv, wo, w1, w2 = params
    B, S, D = x.shape
    Q = (x @ wq).reshape(B, S, n_heads, d_k).transpose(0, 2, 1, 3)
    K = (x @ wk).reshape(B, S, n_heads, d_k).transpose(0, 2, 1, 3)
    V = (x @ wv).reshape(B, S, n_heads, d_v).transpose(0, 2, 1, 3)
    scores = jnp.einsum('bhqd,bhkd->bhqk', Q, K) / math.sqrt(d_k)
    scores = jnp.where(attn_mask[:, None, :, :] > 0.5, -1e9, scores)
    attn = jax.nn.softmax(scores, axis=-1)
    ctx = jnp.einsum('bhqk,bhkd->bhqd', attn, V)
    ctx = ctx.transpose(0, 2, 1, 3).reshape(B, S, n_heads * d_v)
    y = _layer_norm_f32(ctx @ wo + x)
    ffn = jnp.maximum(y @ w1, 0.0) @ w2
    return _layer_norm_f32(ffn + y), attn


if __name__ == "__main__":
    # Small shapes consistent with the module.
    B, S = 2, 8
    d_model, d_k, d_v, n_heads, d_ff = 32, 8, 8, 4, 64

    key = jax.random.PRNGKey(0)
    kx, km, k1, k2, k3, k4, k5, k6 = jax.random.split(key, 8)

    x = jax.random.normal(kx, (B, S, d_model), dtype=jnp.float32)
    # attention mask: 1.0 = masked position (like the boolean mask in PyTorch)
    attn_mask = jax.random.bernoulli(km, 0.3, (B, S, S)).astype(jnp.float32)

    scale = 0.1
    params = (
        scale * jax.random.normal(k1, (d_model, n_heads * d_k), jnp.float32),  # W_Q
        scale * jax.random.normal(k2, (d_model, n_heads * d_k), jnp.float32),  # W_K
        scale * jax.random.normal(k3, (d_model, n_heads * d_v), jnp.float32),  # W_V
        scale * jax.random.normal(k4, (n_heads * d_v, d_model), jnp.float32),  # fc
        scale * jax.random.normal(k5, (d_model, d_ff), jnp.float32),           # ffn W1
        scale * jax.random.normal(k6, (d_ff, d_model), jnp.float32),           # ffn W2
    )

    run = jax.jit(functools.partial(encoder_layer, n_heads=n_heads, d_k=d_k,
                                    d_v=d_v, return_attn=True))
    enc_out, attn = run(x, attn_mask, params)
    jax.block_until_ready((enc_out, attn))

    run_noattn = jax.jit(functools.partial(encoder_layer, n_heads=n_heads,
                                           d_k=d_k, d_v=d_v, return_attn=False))
    enc_out_only = run_noattn(x, attn_mask, params)
    jax.block_until_ready(enc_out_only)

    ref_out, ref_attn = reference_encoder_layer(x, attn_mask, params,
                                                n_heads=n_heads, d_k=d_k, d_v=d_v)

    # bf16 MXU operands (f32 accumulation) -> tolerances loosened vs pure-f32 ref.
    assert jnp.allclose(enc_out, ref_out, atol=3e-2, rtol=3e-2), "output mismatch"
    assert jnp.allclose(attn, ref_attn, atol=1e-2, rtol=1e-2), "attn mismatch"
    assert jnp.allclose(enc_out_only, ref_out, atol=3e-2, rtol=3e-2), \
        "output (return_attn=False) mismatch"

    print("KERNEL_OK")
</pallas_src>

<mosaic_0001>
module attributes {stable_mosaic.version = 11 : i64} {
  func.func @encoder_layer_kernel(%arg0: i32, %arg1: memref<1x8x32xf32, #tpu.memory_space<vmem>>, %arg2: memref<1x8x8xbf16, #tpu.memory_space<vmem>>, %arg3: memref<4x32x8xbf16, #tpu.memory_space<vmem>>, %arg4: memref<4x32x8xbf16, #tpu.memory_space<vmem>>, %arg5: memref<4x32x8xbf16, #tpu.memory_space<vmem>>, %arg6: memref<4x8x32xbf16, #tpu.memory_space<vmem>>, %arg7: memref<32x64xbf16, #tpu.memory_space<vmem>>, %arg8: memref<64x32xbf16, #tpu.memory_space<vmem>>, %arg9: memref<1x8x32xf32, #tpu.memory_space<vmem>>, %arg10: memref<1x4x8x8xf32, #tpu.memory_space<vmem>>) attributes {dimension_semantics = [#tpu.dimension_semantics<parallel>], iteration_bounds = array<i64: 2>, scalar_prefetch = 0 : i64, scratch_operands = 0 : i64, tpu.core_type = #tpu.core_type<tc>, window_params = [{transform_indices = @transform_0, window_bounds = array<i64: 1, 8, 32>}, {transform_indices = @transform_1, window_bounds = array<i64: 1, 8, 8>}, {pipeline_mode = #tpu.pipeline_mode<synchronous>, transform_indices = @transform_2, window_bounds = array<i64: 4, 32, 8>}, {pipeline_mode = #tpu.pipeline_mode<synchronous>, transform_indices = @transform_3, window_bounds = array<i64: 4, 32, 8>}, {pipeline_mode = #tpu.pipeline_mode<synchronous>, transform_indices = @transform_4, window_bounds = array<i64: 4, 32, 8>}, {pipeline_mode = #tpu.pipeline_mode<synchronous>, transform_indices = @transform_5, window_bounds = array<i64: 4, 8, 32>}, {pipeline_mode = #tpu.pipeline_mode<synchronous>, transform_indices = @transform_6, window_bounds = array<i64: 32, 64>}, {pipeline_mode = #tpu.pipeline_mode<synchronous>, transform_indices = @transform_7, window_bounds = array<i64: 64, 32>}, {transform_indices = @transform_8, window_bounds = array<i64: 1, 8, 32>}, {transform_indices = @transform_9, window_bounds = array<i64: 1, 4, 8, 8>}]} {
    %c0 = arith.constant 0 : index
    %c0_0 = arith.constant 0 : index
    %c0_1 = arith.constant 0 : index
    %0 = vector.load %arg1[%c0, %c0_0, %c0_1] : memref<1x8x32xf32, #tpu.memory_space<vmem>>, vector<1x8x32xf32>
    %1 = vector.shape_cast %0 : vector<1x8x32xf32> to vector<8x32xf32>
    %2 = arith.truncf %1 : vector<8x32xf32> to vector<8x32xbf16>
    %c0_2 = arith.constant 0 : index
    %c0_3 = arith.constant 0 : index
    %c0_4 = arith.constant 0 : index
    %3 = vector.load %arg2[%c0_2, %c0_3, %c0_4] : memref<1x8x8xbf16, #tpu.memory_space<vmem>>, vector<1x8x8xbf16>
    %4 = vector.shape_cast %3 : vector<1x8x8xbf16> to vector<8x8xbf16>
    %5 = arith.extf %4 : vector<8x8xbf16> to vector<8x8xf32>
    %6 = vector.shape_cast %2 : vector<8x32xbf16> to vector<1x8x32xbf16>
    %7 = vector.broadcast %6 : vector<1x8x32xbf16> to vector<4x8x32xbf16>
    %c0_5 = arith.constant 0 : index
    %c0_6 = arith.constant 0 : index
    %c0_7 = arith.constant 0 : index
    %8 = vector.load %arg3[%c0_5, %c0_6, %c0_7] : memref<4x32x8xbf16, #tpu.memory_space<vmem>>, vector<4x32x8xbf16>
    %cst = arith.constant dense<0.000000e+00> : vector<4x8x8xf32>
    %9 = tpu.matmul %7, %8, %cst {dimension_numbers = #tpu.dot_dimension_numbers<[2], [1], [1], [2], [0, 0, 0, 1, 1, 2], [0], [0]>} : vector<4x8x32xbf16>, vector<4x32x8xbf16>, vector<4x8x8xf32> -> vector<4x8x8xf32>
    %c0_8 = arith.constant 0 : index
    %c0_9 = arith.constant 0 : index
    %c0_10 = arith.constant 0 : index
    %10 = vector.load %arg4[%c0_8, %c0_9, %c0_10] : memref<4x32x8xbf16, #tpu.memory_space<vmem>>, vector<4x32x8xbf16>
    %cst_11 = arith.constant dense<0.000000e+00> : vector<4x8x8xf32>
    %11 = tpu.matmul %7, %10, %cst_11 {dimension_numbers = #tpu.dot_dimension_numbers<[2], [1], [1], [2], [0, 0, 0, 1, 1, 2], [0], [0]>} : vector<4x8x32xbf16>, vector<4x32x8xbf16>, vector<4x8x8xf32> -> vector<4x8x8xf32>
    %c0_12 = arith.constant 0 : index
    %c0_13 = arith.constant 0 : index
    %c0_14 = arith.constant 0 : index
    %12 = vector.load %arg5[%c0_12, %c0_13, %c0_14] : memref<4x32x8xbf16, #tpu.memory_space<vmem>>, vector<4x32x8xbf16>
    %cst_15 = arith.constant dense<0.000000e+00> : vector<4x8x8xf32>
    %13 = tpu.matmul %7, %12, %cst_15 {dimension_numbers = #tpu.dot_dimension_numbers<[2], [1], [1], [2], [0, 0, 0, 1, 1, 2], [0], [0]>} : vector<4x8x32xbf16>, vector<4x32x8xbf16>, vector<4x8x8xf32> -> vector<4x8x8xf32>
    %14 = arith.truncf %13 : vector<4x8x8xf32> to vector<4x8x8xbf16>
    %15 = arith.truncf %9 : vector<4x8x8xf32> to vector<4x8x8xbf16>
    %16 = arith.truncf %11 : vector<4x8x8xf32> to vector<4x8x8xbf16>
    %cst_16 = arith.constant dense<0.000000e+00> : vector<4x8x8xf32>
    %17 = tpu.matmul %15, %16, %cst_16 {dimension_numbers = #tpu.dot_dimension_numbers<[2], [2], [1], [1], [0, 0, 0, 1, 1, 1], [0], [0]>} : vector<4x8x8xbf16>, vector<4x8x8xbf16>, vector<4x8x8xf32> -> vector<4x8x8xf32>
    %cst_17 = arith.constant 0.353553385 : f32
    %18 = vector.broadcast %cst_17 : f32 to vector<4x8x8xf32>
    %19 = arith.mulf %17, %18 : vector<4x8x8xf32>
    %20 = vector.shape_cast %5 : vector<8x8xf32> to vector<1x8x8xf32>
    %21 = vector.broadcast %20 : vector<1x8x8xf32> to vector<4x8x8xf32>
    %22 = arith.addf %19, %21 : vector<4x8x8xf32>
    %cst_18 = arith.constant dense<0xFF800000> : vector<4x8xf32>
    %23 = vector.multi_reduction <maximumf>, %22, %cst_18 [2] : vector<4x8x8xf32> to vector<4x8xf32>
    %24 = vector.shape_cast %23 : vector<4x8xf32> to vector<4x8x1xf32>
    %25 = vector.broadcast %24 : vector<4x8x1xf32> to vector<4x8x8xf32>
    %26 = arith.subf %22, %25 : vector<4x8x8xf32>
    %27 = math.exp %26 : vector<4x8x8xf32>
    %cst_19 = arith.constant dense<0.000000e+00> : vector<4x8xf32>
    %28 = vector.multi_reduction <add>, %27, %cst_19 [2] : vector<4x8x8xf32> to vector<4x8xf32>
    %29 = vector.shape_cast %28 : vector<4x8xf32> to vector<4x8x1xf32>
    %30 = tpu.reciprocal %29 {approx = true} : vector<4x8x1xf32> -> vector<4x8x1xf32>
    %31 = vector.broadcast %30 : vector<4x8x1xf32> to vector<4x8x8xf32>
    %32 = arith.mulf %27, %31 : vector<4x8x8xf32>
    %c0_20 = arith.constant 0 : index
    %c0_21 = arith.constant 0 : index
    %c0_22 = arith.constant 0 : index
    %c0_23 = arith.constant 0 : index
    %33 = vector.load %arg10[%c0_20, %c0_21, %c0_22, %c0_23] : memref<1x4x8x8xf32, #tpu.memory_space<vmem>>, vector<1x4x8x8xf32>
    %34 = vector.shape_cast %33 : vector<1x4x8x8xf32> to vector<4x8x8xf32>
    %35 = vector.shape_cast %32 : vector<4x8x8xf32> to vector<1x4x8x8xf32>
    tpu.vector_store %arg10[%c0_20, %c0_21, %c0_22, %c0_23], %35 {strides = array<i32>} : memref<1x4x8x8xf32, #tpu.memory_space<vmem>>, vector<1x4x8x8xf32>,
    %36 = arith.truncf %32 : vector<4x8x8xf32> to vector<4x8x8xbf16>
    %cst_24 = arith.constant dense<0.000000e+00> : vector<4x8x8xf32>
    %37 = tpu.matmul %36, %14, %cst_24 {dimension_numbers = #tpu.dot_dimension_numbers<[2], [1], [1], [2], [0, 0, 0, 1, 1, 2], [0], [0]>} : vector<4x8x8xbf16>, vector<4x8x8xbf16>, vector<4x8x8xf32> -> vector<4x8x8xf32>
    %38 = arith.truncf %37 : vector<4x8x8xf32> to vector<4x8x8xbf16>
    %c0_25 = arith.constant 0 : index
    %c0_26 = arith.constant 0 : index
    %c0_27 = arith.constant 0 : index
    %39 = vector.load %arg6[%c0_25, %c0_26, %c0_27] : memref<4x8x32xbf16, #tpu.memory_space<vmem>>, vector<4x8x32xbf16>
    %cst_28 = arith.constant dense<0.000000e+00> : vector<4x8x32xf32>
    %40 = tpu.matmul %38, %39, %cst_28 {dimension_numbers = #tpu.dot_dimension_numbers<[2], [1], [1], [2], [0, 0, 0, 1, 1, 2], [0], [0]>} : vector<4x8x8xbf16>, vector<4x8x32xbf16>, vector<4x8x32xf32> -> vector<4x8x32xf32>
    %cst_29 = arith.constant dense<0.000000e+00> : vector<8x32xf32>
    %41 = vector.multi_reduction <add>, %40, %cst_29 [0] : vector<4x8x32xf32> to vector<8x32xf32>
    %42 = arith.addf %41, %1 : vector<8x32xf32>
    %cst_30 = arith.constant dense<0.000000e+00> : vector<8xf32>
    %43 = vector.multi_reduction <add>, %42, %cst_30 [1] : vector<8x32xf32> to vector<8xf32>
    %44 = vector.shape_cast %43 : vector<8xf32> to vector<8x1xf32>
    %cst_31 = arith.constant 3.200000e+01 : f32
    %45 = vector.broadcast %cst_31 : f32 to vector<8x1xf32>
    %46 = arith.divf %44, %45 : vector<8x1xf32>
    %47 = vector.broadcast %46 : vector<8x1xf32> to vector<8x32xf32>
    %48 = arith.subf %42, %47 : vector<8x32xf32>
    %49 = arith.mulf %48, %48 : vector<8x32xf32>
    %cst_32 = arith.constant dense<0.000000e+00> : vector<8xf32>
    %50 = vector.multi_reduction <add>, %49, %cst_32 [1] : vector<8x32xf32> to vector<8xf32>
    %51 = vector.shape_cast %50 : vector<8xf32> to vector<8x1xf32>
    %cst_33 = arith.constant 3.200000e+01 : f32
    %52 = vector.broadcast %cst_33 : f32 to vector<8x1xf32>
    %53 = arith.divf %51, %52 : vector<8x1xf32>
    %cst_34 = arith.constant 9.99999974E-6 : f32
    %54 = vector.broadcast %cst_34 : f32 to vector<8x1xf32>
    %55 = arith.addf %53, %54 : vector<8x1xf32>
    %56 = math.rsqrt %55 : vector<8x1xf32>
    %57 = vector.broadcast %56 : vector<8x1xf32> to vector<8x32xf32>
    %58 = arith.mulf %48, %57 : vector<8x32xf32>
    %59 = arith.truncf %58 : vector<8x32xf32> to vector<8x32xbf16>
    %c0_35 = arith.constant 0 : index
    %c0_36 = arith.constant 0 : index
    %60 = vector.load %arg7[%c0_35, %c0_36] : memref<32x64xbf16, #tpu.memory_space<vmem>>, vector<32x64xbf16>
    %cst_37 = arith.constant dense<0.000000e+00> : vector<8x64xf32>
    %61 = tpu.matmul %59, %60, %cst_37 {dimension_numbers = #tpu.dot_dimension_numbers<[1], [0], [0], [1], [0, 0, 1, 1], [], []>} : vector<8x32xbf16>, vector<32x64xbf16>, vector<8x64xf32> -> vector<8x64xf32>
    %cst_38 = arith.constant 0.000000e+00 : f32
    %62 = vector.broadcast %cst_38 : f32 to vector<8x64xf32>
    %63 = arith.maximumf %61, %62 : vector<8x64xf32>
    %64 = arith.truncf %63 : vector<8x64xf32> to vector<8x64xbf16>
    %c0_39 = arith.constant 0 : index
    %c0_40 = arith.constant 0 : index
    %65 = vector.load %arg8[%c0_39, %c0_40] : memref<64x32xbf16, #tpu.memory_space<vmem>>, vector<64x32xbf16>
    %cst_41 = arith.constant dense<0.000000e+00> : vector<8x32xf32>
    %66 = tpu.matmul %64, %65, %cst_41 {dimension_numbers = #tpu.dot_dimension_numbers<[1], [0], [0], [1], [0, 0, 1, 1], [], []>} : vector<8x64xbf16>, vector<64x32xbf16>, vector<8x32xf32> -> vector<8x32xf32>
    %67 = arith.addf %66, %58 : vector<8x32xf32>
    %cst_42 = arith.constant dense<0.000000e+00> : vector<8xf32>
    %68 = vector.multi_reduction <add>, %67, %cst_42 [1] : vector<8x32xf32> to vector<8xf32>
    %69 = vector.shape_cast %68 : vector<8xf32> to vector<8x1xf32>
    %cst_43 = arith.constant 3.200000e+01 : f32
    %70 = vector.broadcast %cst_43 : f32 to vector<8x1xf32>
    %71 = arith.divf %69, %70 : vector<8x1xf32>
    %72 = vector.broadcast %71 : vector<8x1xf32> to vector<8x32xf32>
    %73 = arith.subf %67, %72 : vector<8x32xf32>
    %74 = arith.mulf %73, %73 : vector<8x32xf32>
    %cst_44 = arith.constant dense<0.000000e+00> : vector<8xf32>
    %75 = vector.multi_reduction <add>, %74, %cst_44 [1] : vector<8x32xf32> to vector<8xf32>
    %76 = vector.shape_cast %75 : vector<8xf32> to vector<8x1xf32>
    %cst_45 = arith.constant 3.200000e+01 : f32
    %77 = vector.broadcast %cst_45 : f32 to vector<8x1xf32>
    %78 = arith.divf %76, %77 : vector<8x1xf32>
    %cst_46 = arith.constant 9.99999974E-6 : f32
    %79 = vector.broadcast %cst_46 : f32 to vector<8x1xf32>
    %80 = arith.addf %78, %79 : vector<8x1xf32>
    %81 = math.rsqrt %80 : vector<8x1xf32>
    %82 = vector.broadcast %81 : vector<8x1xf32> to vector<8x32xf32>
    %83 = arith.mulf %73, %82 : vector<8x32xf32>
    %c0_47 = arith.constant 0 : index
    %c0_48 = arith.constant 0 : index
    %c0_49 = arith.constant 0 : index
    %84 = vector.load %arg9[%c0_47, %c0_48, %c0_49] : memref<1x8x32xf32, #tpu.memory_space<vmem>>, vector<1x8x32xf32>
    %85 = vector.shape_cast %84 : vector<1x8x32xf32> to vector<8x32xf32>
    %86 = vector.shape_cast %83 : vector<8x32xf32> to vector<1x8x32xf32>
    tpu.vector_store %arg9[%c0_47, %c0_48, %c0_49], %86 {strides = array<i32>} : memref<1x8x32xf32, #tpu.memory_space<vmem>>, vector<1x8x32xf32>,
    return
  }
  func.func @transform_0(%arg0: i32) -> (i32, i32, i32) {
    %c0_i32 = arith.constant 0 : i32
    %c0_i32_0 = arith.constant 0 : i32
    %c0_i32_1 = arith.constant 0 : i32
    return %arg0, %c0_i32, %c0_i32_0 : i32, i32, i32
  }
  func.func @transform_1(%arg0: i32) -> (i32, i32, i32) {
    %c0_i32 = arith.constant 0 : i32
    %c0_i32_0 = arith.constant 0 : i32
    %c0_i32_1 = arith.constant 0 : i32
    return %arg0, %c0_i32, %c0_i32_0 : i32, i32, i32
  }
  func.func @transform_2(%arg0: i32) -> (i32, i32, i32) {
    %c0_i32 = arith.constant 0 : i32
    %c0_i32_0 = arith.constant 0 : i32
    %c0_i32_1 = arith.constant 0 : i32
    %c0_i32_2 = arith.constant 0 : i32
    return %c0_i32, %c0_i32_0, %c0_i32_1 : i32, i32, i32
  }
  func.func @transform_3(%arg0: i32) -> (i32, i32, i32) {
    %c0_i32 = arith.constant 0 : i32
    %c0_i32_0 = arith.constant 0 : i32
    %c0_i32_1 = arith.constant 0 : i32
    %c0_i32_2 = arith.constant 0 : i32
    return %c0_i32, %c0_i32_0, %c0_i32_1 : i32, i32, i32
  }
  func.func @transform_4(%arg0: i32) -> (i32, i32, i32) {
    %c0_i32 = arith.constant 0 : i32
    %c0_i32_0 = arith.constant 0 : i32
    %c0_i32_1 = arith.constant 0 : i32
    %c0_i32_2 = arith.constant 0 : i32
    return %c0_i32, %c0_i32_0, %c0_i32_1 : i32, i32, i32
  }
  func.func @transform_5(%arg0: i32) -> (i32, i32, i32) {
    %c0_i32 = arith.constant 0 : i32
    %c0_i32_0 = arith.constant 0 : i32
    %c0_i32_1 = arith.constant 0 : i32
    %c0_i32_2 = arith.constant 0 : i32
    return %c0_i32, %c0_i32_0, %c0_i32_1 : i32, i32, i32
  }
  func.func @transform_6(%arg0: i32) -> (i32, i32) {
    %c0_i32 = arith.constant 0 : i32
    %c0_i32_0 = arith.constant 0 : i32
    %c0_i32_1 = arith.constant 0 : i32
    return %c0_i32, %c0_i32_0 : i32, i32
  }
  func.func @transform_7(%arg0: i32) -> (i32, i32) {
    %c0_i32 = arith.constant 0 : i32
    %c0_i32_0 = arith.constant 0 : i32
    %c0_i32_1 = arith.constant 0 : i32
    return %c0_i32, %c0_i32_0 : i32, i32
  }
  func.func @transform_8(%arg0: i32) -> (i32, i32, i32) {
    %c0_i32 = arith.constant 0 : i32
    %c0_i32_0 = arith.constant 0 : i32
    %c0_i32_1 = arith.constant 0 : i32
    return %arg0, %c0_i32, %c0_i32_0 : i32, i32, i32
  }
  func.func @transform_9(%arg0: i32) -> (i32, i32, i32, i32) {
    %c0_i32 = arith.constant 0 : i32
    %c0_i32_0 = arith.constant 0 : i32
    %c0_i32_1 = arith.constant 0 : i32
    %c0_i32_2 = arith.constant 0 : i32
    return %arg0, %c0_i32, %c0_i32_0, %c0_i32_1 : i32, i32, i32, i32
  }
}

</mosaic_0001>

<bundles_post_ra>
// kernel: encoder_layer.1
= control target key start
LH: loop header
LB: loop body
LE: loop exit
PB: predicated region body
PF: predicated region fallthrough
CT: control target
= control target key end

     0   :  { %s2975_s0 = inlined_call_operand.vmem [shape: f32[2,8,32], index: 0, kind: input, shape index: {}]   ;;  %s2976_s1 = inlined_call_operand.vmem [shape: bf16[2,8,8], index: 1, kind: input, shape index: {}]   ;;  %s2977_s2 = inlined_call_operand.vmem [shape: bf16[4,32,8], index: 2, kind: input, shape index: {}]   ;;  %s2978_s3 = inlined_call_operand.vmem [shape: bf16[4,32,8], index: 3, kind: input, shape index: {}]   ;;  %s2979_s4 = inlined_call_operand.vmem [shape: bf16[4,32,8], index: 4, kind: input, shape index: {}]   ;;  %s2980_s5 = inlined_call_operand.vmem [shape: bf16[4,8,32], index: 5, kind: input, shape index: {}]   ;;  %s2981_s6 = inlined_call_operand.vmem [shape: bf16[32,64], index: 6, kind: input, shape index: {}]   ;;  %s2982_s7 = inlined_call_operand.vmem [shape: bf16[64,32], index: 7, kind: input, shape index: {}]   ;;  %s2983_s8 = inlined_call_operand.hbm [shape: f32[2,8,32], index: 8, kind: output, shape index: {0}]   ;;  %s2984_s9 = inlined_call_operand.hbm [shape: f32[2,4,8,8], index: 9, kind: output, shape index: {1}]  }
   0x1   :  { %2985 = sst [smem:[#allocation8_spill]] %s2975_s0 }
   0x2   :  { %2986 = sst [smem:[#allocation9_spill]] %s2976_s1 }
   0x3   :  { %15 = vsyncpa [#allocation3], 0 }
   0x4   :  { %17 = vsyncpa [#allocation3 + $0x1], 0 }
   0x5   :  { %18 = vsyncpa [#allocation5], 0 }
   0x6   :  { %20 = vsyncpa [#allocation5 + $0x1], 0  ;;  %s2557_s30 = smov 0   ;;  %s2559_s10 = smov 0  }
   0x7   :  { %s2561_s11 = smov 0   ;;  %s2563_s12 = smov 0  }
   0x8 LB: > { %s2578_s13 = sadd.s32 4294967295, %s2499_s12   ;;  %s1983_s14 = sadd.s32 4294967294, %s2499_s12   ;;  %s2499_s12 = sphi %s2563_s12, %s2995_s12   ;;  %s2495_s11 = sphi %s2561_s11, %s2994_s11   ;;  %s2491_s10 = sphi %s2559_s10, %s2993_s10   ;;  %s2487_s30 = sphi %s2557_s30, %s2992_s30  }
   0x9   : > { %s2582_s15 = sadd.s32 1, %s2499_s12   ;;  %s211_s16 = sadd.s32 1, %s2495_s11 }
   0xa   : > { %s208_s17 = ssub.s32 %s2499_s12, %s2582_s15  ;;  %p221_p0 = scmp.ne.s32.totalorder %s2495_s11, %s2491_s10 }
   0xb   : > { %p209_p1 = scmp.eq.s32.totalorder %s208_s17, 0  ;;  %p222_p2 = scmp.eq.s32.totalorder %s2578_s13, 1 }
   0xc   : > { %p227_p3 = scmp.ne.s32.totalorder %s2491_s10, %s2487_s30  ;;  %p228_p4 = scmp.eq.s32.totalorder %s1983_s14, 1 }
   0xd   : > { %s2593_s18 = scalar_select %p209_p1, %s2495_s11, %s211_s16  }
   0xe   : > { %p2595_p5 = por %p222_p2, %p221_p0  ;;  %p2599_p6 = por %p228_p4, %p227_p3 }
   0xf   : > { %p1986_p7 = scmp.ge.s32.totalorder %s2499_s12, 1  ;;  %p304_p8 = scmp.lt.s32.totalorder %s2499_s12, 3 }
  0x11   : > { %p305_p9 = pnand %p1986_p7, %p304_p8 }
  0x12   : > { %p348_p10 = scmp.lt.s32.totalorder (!%p305_p9), %s2578_s13, 1  ;;  %s2989_s0 = sld [smem:[#allocation8_spill]] (!%p305_p9) }
  0x13   : > { %308 = sbr.rel (%p305_p9) target bundleno = 2183 (0x887), region = 52  ;;  %s2990_s1 = sld [smem:[#allocation9_spill]] (!%p305_p9) }
  0x14   : > { %s2054_s25 = sshll.u32 (!%p305_p9), %s2578_s13, 9  ;;  %s2503_s17 = smov (!%p305_p9), [#allocation4]  }
  0x15   : > { %s2914_s28 = scalar_lea.hbm (!%p305_p9), %s2984_s9, %s2054_s25 }
  0x18   : > { %v2359_v0 = vld [vmem:[%s2977_s2 + $0x8] sm:$0xff]   ;;  %v2501_v1 = vmov 0.0   ;;  %v2360_v2 = vld [vmem:[%s2977_s2 + $0x18] sm:$0xff]   ;;  %v2361_v3 = vld [vmem:[%s2977_s2] sm:$0xff]   ;;  %vm2502_vm0 = vmmov 0   ;;  %s2627_s29 = scalar_select %p348_p10, %s2578_s13, 1 }
  0x19   : > { %2123 = vmatprep.subr.bf16.mxu0 %v2501_v1  ;;  %2131 = vmatprep.subr.bf16.mxu1 %v2501_v1  ;;  %v2362_v4 = vld [vmem:[%s2977_s2 + $0x10] sm:$0xff]   ;;  %v2363_v5 = vld [vmem:[%s2977_s2 + $0x28] sm:$0xff]   ;;  %v2364_v6 = vld [vmem:[%s2977_s2 + $0x38] sm:$0xff]   ;;  %vm389_vm1 = vcmask 261120   ;;  %vm1049_vm2 = vcmask 64512   ;;  %vm1297_vm3 = vcmask 1043456  }
  0x1a   : > { %2124 = vmatpush3.bf16.msra.mxu0 %v2359_v0  ;;  %2127 = vmatprep.mubr.msk.bf16.mxu0 %vm2502_vm0, %v2501_v1  ;;  %s1989_s14 = sshll.u32 %s2627_s29, 3  ;;  %v2365_v9 = vld [vmem:[%s2977_s2 + $0x20] sm:$0xff]   ;;  %v2366_v10 = vld [vmem:[%s2977_s2 + $0x30] sm:$0xff]   ;;  %v2367_v11 = vld [vmem:[%s2978_s3 + $0x8] sm:$0xff]   ;;  %vm1787_vm4 = vcmask 523264  }
  0x1b   : > { %2132 = vmatpush3.bf16.msra.mxu1 %v2360_v2  ;;  %2125 = vmatprep.subr.bf16.mxu0 %v2501_v1  ;;  %s351_s23 = scalar_lea.vmem %s2989_s0, %s1989_s14  ;;  %v2368_v12 = vld [vmem:[%s2978_s3 + $0x18] sm:$0xff]   ;;  %v2369_v13 = vld [vmem:[%s2978_s3] sm:$0xff]   ;;  %v2370_v14 = vld [vmem:[%s2978_s3 + $0x10] sm:$0xff]   ;;  %s1990_s14 = sshll.u32 %s2627_s29, 2 }
  0x1c   : > { %2133 = vmatprep.subr.bf16.mxu1 %v2501_v1  ;;  %2135 = vmatprep.mubr.msk.bf16.mxu1 %vm2502_vm0, %v2501_v1  ;;  %v2640_v7 = vld [vmem:[%s351_s23] sm:$0xff]  ;;  %v2371_v15 = vld [vmem:[%s2978_s3 + $0x28] sm:$0xff]   ;;  %v2372_v16 = vld [vmem:[%s2978_s3 + $0x38] sm:$0xff]   ;;  %s355_s21 = scalar_lea.vmem %s2990_s1, %s1990_s14  ;;  %s2810_s29 = sand.u32 1, %s2491_s10  }
  0x1d   : > { %v2645_v8 = vpack.c.bf16 %v2640_v7, %v2640_v7  ;;  %v2373_v17 = vld [vmem:[%s2978_s3 + $0x20] sm:$0xff]   ;;  %v2374_v18 = vld [vmem:[%s2978_s3 + $0x30] sm:$0xff]   ;;  %v2375_v19 = vld [vmem:[%s2979_s4 + $0x8] sm:$0xff]   ;;  %s1988_s22 = sshll.u32 %s2810_s29, 5 }
  0x1e   : > { %2126 = vmatpush3.bf16.msra.mxu0 %v2361_v3  ;;  %v2376_v20 = vld [vmem:[%s2979_s4] sm:$0xff]   ;;  %v2377_v21 = vld [vmem:[%s2979_s4 + $0x18] sm:$0xff]   ;;  %v2378_v22 = vld [vmem:[%s2979_s4 + $0x10] sm:$0xff]   ;;  %s2815_s23 = scalar_lea.vmem [#allocation4], %s1988_s22 }
  0x1f   : > { %2134 = vmatpush3.bf16.msra.mxu1 %v2362_v4  ;;  %2139 = vmatprep.subr.bf16.mxu0 %v2501_v1  ;;  %v2379_v23 = vld [vmem:[%s2979_s4 + $0x28] sm:$0xff]   ;;  %v2380_v24 = vld [vmem:[%s2979_s4 + $0x20] sm:$0xff]   ;;  %v2381_v25 = vld [vmem:[%s2979_s4 + $0x38] sm:$0xff]   ;;  %s1877_s24 = sshll.u32 %s2815_s23, 4  ;;  %s2909_s24 = int_to_ptr.vmem [resolvable:$true] %s1877_s24 }
  0x20   : > { %2147 = vmatprep.subr.bf16.mxu1 %v2501_v1  ;;  %v2382_v26 = vld [vmem:[%s2979_s4 + $0x30] sm:$0xff]   ;;  %s2409_s16 = scalar_lea.vmem %s2909_s24, 512 }
  0x21   : > { %2128 = vmatmul.mubr.msk.bf16.vlgmr.msra.gmra.mxu0 %vm389_vm1, %v2645_v8  ;;  %p2410_p11 = scmp.ne.s32.totalorder %s2909_s24, %s2409_s16 }
  0x22   : > { %2136 = vmatmul.mubr.msk.bf16.vlgmr.msra.gmra.mxu1 %vm389_vm1, %v2645_v8  ;;  %2140 = vmatpush3.bf16.msra.mxu0 %v2363_v5 }
  0x23   : > { %2148 = vmatpush3.bf16.msra.mxu1 %v2364_v6  ;;  %2141 = vmatprep.subr.bf16.mxu0 %v2501_v1  ;;  %p2411_p12 = pnand %p2410_p11, %p2595_p5 }
  0x24   : > { %2149 = vmatprep.subr.bf16.mxu1 %v2501_v1  ;;  %2143 = vmatprep.mubr.msk.bf16.mxu0 %vm2502_vm0, %v2501_v1 }
  0x25   : > { %2151 = vmatprep.mubr.msk.bf16.mxu1 %vm2502_vm0, %v2501_v1  ;;  %p2412_p13 = pneg %p2411_p12 }
  0x26   : > { %2142 = vmatpush3.bf16.msra.mxu0 %v2365_v9 }
  0x27   : > { %2150 = vmatpush3.bf16.msra.mxu1 %v2366_v10  ;;  %2155 = vmatprep.subr.bf16.mxu0 %v2501_v1 }
  0x28   : > { %2163 = vmatprep.subr.bf16.mxu1 %v2501_v1 }
  0x29   : > { %2144 = vmatmul.mubr.msk.bf16.vlgmr.msra.gmra.mxu0 %vm389_vm1, %v2645_v8 }
  0x2a   : > { %2152 = vmatmul.mubr.msk.bf16.vlgmr.msra.gmra.mxu1 %vm389_vm1, %v2645_v8  ;;  %2156 = vmatpush3.bf16.msra.mxu0 %v2367_v11 }
  0x2b   : > { %2164 = vmatpush3.bf16.msra.mxu1 %v2368_v12  ;;  %2157 = vmatprep.subr.bf16.mxu0 %v2501_v1 }
  0x2c   : > { %2165 = vmatprep.subr.bf16.mxu1 %v2501_v1  ;;  %2159 = vmatprep.mubr.msk.bf16.mxu0 %vm2502_vm0, %v2501_v1 }
  0x2d   : > { %2167 = vmatprep.mubr.msk.bf16.mxu1 %vm2502_vm0, %v2501_v1 }
  0x2e   : > { %2158 = vmatpush3.bf16.msra.mxu0 %v2369_v13 }
  0x2f   : > { %2166 = vmatpush3.bf16.msra.mxu1 %v2370_v14  ;;  %2171 = vmatprep.subr.bf16.mxu0 %v2501_v1 }
  0x30   : > { %2179 = vmatprep.subr.bf16.mxu1 %v2501_v1 }
  0x31   : > { %2160 = vmatmul.mubr.msk.bf16.vlgmr.msra.gmra.mxu0 %vm389_vm1, %v2645_v8 }
  0x32   : > { %2168 = vmatmul.mubr.msk.bf16.vlgmr.msra.gmra.mxu1 %vm389_vm1, %v2645_v8  ;;  %2172 = vmatpush3.bf16.msra.mxu0 %v2371_v15 }
  0x33   : > { %2180 = vmatpush3.bf16.msra.mxu1 %v2372_v16  ;;  %2173 = vmatprep.subr.bf16.mxu0 %v2501_v1 }
  0x34   : > { %2181 = vmatprep.subr.bf16.mxu1 %v2501_v1  ;;  %2175 = vmatprep.mubr.msk.bf16.mxu0 %vm2502_vm0, %v2501_v1 }
  0x35   : > { %2183 = vmatprep.mubr.msk.bf16.mxu1 %vm2502_vm0, %v2501_v1 }
  0x36   : > { %2174 = vmatpush3.bf16.msra.mxu0 %v2373_v17 }
  0x37   : > { %2182 = vmatpush3.bf16.msra.mxu1 %v2374_v18  ;;  %2187 = vmatprep.subr.bf16.mxu0 %v2501_v1 }
  0x38   : > { %2195 = vmatprep.subr.bf16.mxu1 %v2501_v1 }
  0x39   : > { %2176 = vmatmul.mubr.msk.bf16.vlgmr.msra.gmra.mxu0 %vm389_vm1, %v2645_v8 }
  0x3a   : > { %2184 = vmatmul.mubr.msk.bf16.vlgmr.msra.gmra.mxu1 %vm389_vm1, %v2645_v8  ;;  %2188 = vmatpush3.bf16.msra.mxu0 %v2375_v19 }
  0x3b   : > { %2191 = vmatprep.mubr.msk.bf16.mxu0 %vm2502_vm0, %v2501_v1  ;;  %2189 = vmatprep.subr.bf16.mxu0 %v2501_v1 }
  0x3c   : > { %2199 = vmatprep.mubr.msk.bf16.mxu1 %vm2502_vm0, %v2501_v1  ;;  %2196 = vmatpush3.bf16.msra.mxu1 %v2377_v21 }
  0x3d   : > { %2197 = vmatprep.subr.bf16.mxu1 %v2501_v1 }
  0x3e   : > { %2190 = vmatpush3.bf16.msra.mxu0 %v2376_v20 }
  0x3f   : > { %2203 = vmatprep.subr.bf16.mxu0 %v2501_v1 }
  0x40   : > { %2198 = vmatpush3.bf16.msra.mxu1 %v2378_v22 }
  0x41   : > { %2192 = vmatmul.mubr.msk.bf16.vlgmr.msra.gmra.mxu0 %vm389_vm1, %v2645_v8  ;;  %2211 = vmatprep.subr.bf16.mxu1 %v2501_v1 }
  0x42   : > { %2204 = vmatpush3.bf16.msra.mxu0 %v2379_v23  ;;  %2207 = vmatprep.mubr.msk.bf16.mxu0 %vm2502_vm0, %v2501_v1 }
  0x43   : > { %2205 = vmatprep.subr.bf16.mxu0 %v2501_v1  ;;  %2200 = vmatmul.mubr.msk.bf16.vlgmr.msra.gmra.mxu1 %vm389_vm1, %v2645_v8 }
  0x44   : > { %2212 = vmatpush3.bf16.msra.mxu1 %v2381_v25  ;;  %2215 = vmatprep.mubr.msk.bf16.mxu1 %vm2502_vm0, %v2501_v1 }
  0x45   : > { %2213 = vmatprep.subr.bf16.mxu1 %v2501_v1 }
  0x46   : > { %2206 = vmatpush3.bf16.msra.mxu0 %v2380_v24 }
  0x47   : > { %2219 = vmatprep.subr.bf16.mxu0 %v2501_v1 }
  0x48   : > { %2214 = vmatpush3.bf16.msra.mxu1 %v2382_v26 }
  0x49   : > { %2208 = vmatmul.mubr.msk.bf16.vlgmr.msra.gmra.mxu0 %vm389_vm1, %v2645_v8  ;;  %2225 = vmatprep.subr.bf16.mxu1 %v2501_v1 }
  0x4a   : > { %2221 = vmatprep.mubr.msk.bf16.mxu0 %vm2502_vm0, %v2501_v1 }
  0x4b   : > { %2216 = vmatmul.mubr.msk.bf16.vlgmr.msra.gmra.mxu1 %vm389_vm1, %v2645_v8 }
  0x4c   : > { %2227 = vmatprep.mubr.msk.bf16.mxu1 %vm2502_vm0, %v2501_v1 }
  0xe1   : > { %v427_v27 = vpop.f32.mrf.mxu0 }
  0xe2   : > { %v479_v28 = vpop.f32.mrf.mxu1  ;;  %v1041_v57 = vpack.c.bf16 %v427_v27, %v427_v27 }
  0xe3   : > { %v2129_v29 = vpop.f32.mrf.mxu0  ;;  %v1042_v58 = vpack.c.bf16 %v479_v28, %v479_v28 }
  0xe4   : > { %v2137_v30 = vpop.f32.mrf.mxu1  ;;  %v359_v29 = vld [vmem:[%s355_s21] sm:$0xf]  ;;  %s2413_s21 = sshll.u32 %s2503_s17, 4  ;;  %s2414_s21 = int_to_ptr.vmem [resolvable:$false] %s2413_s21 }
  0xe5   : > { %v430_v31 = vpop.f32.mrf.mxu0  ;;  %v360_v30 = vunpack.c.l.bf16 %v359_v29  ;;  %p2416_p0 = scmp.lt.s32.totalorder %s2909_s24, %s2414_s21 }
  0xe6   : > { %v482_v32 = vpop.f32.mrf.mxu1 }
  0xe7   : > { %v2130_v33 = vpop.f32.mrf.mxu0 }
  0xe8   : > { %v2138_v34 = vpop.f32.mrf.mxu1 }
  0xe9   : > { %v531_v35 = vpop.f32.mrf.mxu0 }
  0xea   : > { %v583_v36 = vpop.f32.mrf.mxu1  ;;  %v1043_v6 = vpack.c.bf16 %v531_v35, %v531_v35 }
  0xeb   : > { %v2145_v37 = vpop.f32.mrf.mxu0  ;;  %v1044_v8 = vpack.c.bf16 %v583_v36, %v583_v36 }
  0xec   : > { %v2153_v38 = vpop.f32.mrf.mxu1 }
  0xed   : > { %v534_v39 = vpop.f32.mrf.mxu0 }
  0xee   : > { %v586_v40 = vpop.f32.mrf.mxu1 }
  0xef   : > { %v2146_v41 = vpop.f32.mrf.mxu0 }
  0xf0   : > { %v2154_v42 = vpop.f32.mrf.mxu1 }
  0xf1   : > { %v651_v43 = vpop.f32.mrf.mxu0 }
  0xf2   : > { %v703_v44 = vpop.f32.mrf.mxu1  ;;  %v1045_v45 = vpack.c.bf16 %v651_v43, %v651_v43 }
  0xf3   : > { %v1046_v46 = vpack.c.bf16 %v703_v44, %v703_v44  ;;  %v2161_v47 = vpop.f32.mrf.mxu0 }
  0xf4   : > { %v2169_v48 = vpop.f32.mrf.mxu1  ;;  %v1054_v49 = vsel %vm1049_vm2, %v1045_v45, 0 }
  0xf5   : > { %v1100_v50 = vsel %vm1049_vm2, %v1046_v46, 0  ;;  %v654_v51 = vpop.f32.mrf.mxu0  ;;  %2220 = vmatpush3.bf16.xpose.msra.mxu0 %v1054_v49 }
  0xf6   : > { %v706_v52 = vpop.f32.mrf.mxu1  ;;  %2226 = vmatpush3.bf16.xpose.msra.mxu1 %v1100_v50  ;;  %2231 = vmatprep.subr.bf16.mxu0 %v2501_v1 }
  0xf7   : > { %2237 = vmatprep.subr.bf16.mxu1 %v2501_v1  ;;  %v2162_v53 = vpop.f32.mrf.mxu0 }
  0xf8   : > { %v2170_v54 = vpop.f32.mrf.mxu1 }
  0xf9   : > { %v755_v55 = vpop.f32.mrf.mxu0 }
  0xfa   : > { %v807_v56 = vpop.f32.mrf.mxu1  ;;  %v1047_v59 = vpack.c.bf16 %v755_v55, %v755_v55 }
  0xfb   : > { %v1048_v60 = vpack.c.bf16 %v807_v56, %v807_v56  ;;  %v2177_v61 = vpop.f32.mrf.mxu0 }
  0xfc   : > { %v2185_v62 = vpop.f32.mrf.mxu1  ;;  %v1146_v63 = vsel %vm1049_vm2, %v1047_v59, 0  ;;  %2222 = vmatmul.mubr.msk.bf16.vlgmr.msra.gmra.mxu0 %vm1049_vm2, %v1041_v57 }
  0xfd   : > { %v1192_v0 = vsel %vm1049_vm2, %v1048_v60, 0  ;;  %2228 = vmatmul.mubr.msk.bf16.vlgmr.msra.gmra.mxu1 %vm1049_vm2, %v1042_v58  ;;  %v758_v2 = vpop.f32.mrf.mxu0  ;;  %2232 = vmatpush3.bf16.xpose.msra.mxu0 %v1146_v63 }
  0xfe   : > { %v810_v3 = vpop.f32.mrf.mxu1  ;;  %2238 = vmatpush3.bf16.xpose.msra.mxu1 %v1192_v0  ;;  %2233 = vmatprep.mubr.msk.bf16.mxu0 %vm2502_vm0, %v2501_v1 }
  0xff   : > { %2239 = vmatprep.mubr.msk.bf16.mxu1 %vm2502_vm0, %v2501_v1  ;;  %v2178_v4 = vpop.f32.mrf.mxu0  ;;  %2243 = vmatprep.subr.bf16.mxu0 %v2501_v1 }
 0x100   : > { %v2186_v5 = vpop.f32.mrf.mxu1  ;;  %2249 = vmatprep.subr.bf16.mxu1 %v2501_v1 }
 0x101   : > { %v875_v9 = vpop.f32.mrf.mxu0 }
 0x102   : > { %v1037_v10 = vpack.c.bf16 %v875_v9, %v875_v9 }
 0x103   : > { %v2193_v11 = vpop.f32.mrf.mxu0  ;;  %v927_v14 = vpop.f32.mrf.mxu1 }
 0x104   : > { %2234 = vmatmul.mubr.msk.bf16.vlgmr.msra.gmra.mxu0 %vm1049_vm2, %v1043_v6  ;;  %v1299_v12 = vsel %vm1297_vm3, %v1037_v10, 0  ;;  %v1038_v15 = vpack.c.bf16 %v927_v14, %v927_v14 }
 0x105   : > { %2240 = vmatmul.mubr.msk.bf16.vlgmr.msra.gmra.mxu1 %vm1049_vm2, %v1044_v8  ;;  %2245 = vmatprep.mubr.msk.bf16.mxu0 %vm2502_vm0, %v2501_v1  ;;  %v878_v13 = vpop.f32.mrf.mxu0  ;;  %v2201_v17 = vpop.f32.mrf.mxu1 }
 0x106   : > { %2251 = vmatprep.mubr.msk.bf16.mxu1 %vm2502_vm0, %v2501_v1  ;;  %2244 = vmatpush3.bf16.msra.mxu0 %v1299_v12  ;;  %v1345_v18 = vsel %vm1297_vm3, %v1038_v15, 0 }
 0x107   : > { %2255 = vmatprep.subr.bf16.mxu0 %v2501_v1  ;;  %v2194_v16 = vpop.f32.mrf.mxu0  ;;  %v930_v19 = vpop.f32.mrf.mxu1  ;;  %2250 = vmatpush3.bf16.msra.mxu1 %v1345_v18 }
 0x108   : > { %2261 = vmatprep.subr.bf16.mxu1 %v2501_v1 }
 0x109   : > { %v2792_v20 = vpop.f32.mrf.mxu0  ;;  %v2202_v21 = vpop.f32.mrf.mxu1 }
 0x10b   : > { %v2209_v22 = vpop.f32.mrf.mxu0  ;;  %v2795_v24 = vpop.f32.mrf.mxu1 }
 0x10c   : > { %v1040_v29 = vpack.c.bf16 %v2795_v24, %v2795_v24 }
 0x10d   : > { %v982_v23 = vpop.f32.mrf.mxu0  ;;  %v2217_v26 = vpop.f32.mrf.mxu1 }
 0x10e   : > { %v1039_v23 = vpack.c.bf16 %v2792_v20, %v2792_v20  ;;  %v1437_v24 = vsel %vm1297_vm3, %v1040_v29, 0 }
 0x10f   : > { %v2210_v25 = vpop.f32.mrf.mxu0  ;;  %v1034_v27 = vpop.f32.mrf.mxu1 }
 0x111   : > { %v2218_v28 = vpop.f32.mrf.mxu1 }
 0x112   : > { %v1391_v28 = vsel %vm1297_vm3, %v1039_v23, 0 }
 0x1bc   : > { %v1090_v31 = vpop.f32.mrf.mxu0 }
 0x1bd   : > { %v1136_v32 = vpop.f32.mrf.mxu1  ;;  %v1234_v33 = vmul.f32 0.35355338, %v1090_v31 }
 0x1be   : > { %v1235_v34 = vmul.f32 0.35355338, %v1136_v32  ;;  %v2223_v35 = vpop.f32.mrf.mxu0  ;;  %v1483_v32 = vld [vmem:[%s2980_s5] sm:$0xf] }
 0x1bf   : > { %v2229_v36 = vpop.f32.mrf.mxu1  ;;  %v1238_v37 = vadd.f32 %v1234_v33, %v360_v30  ;;  %v1491_v35 = vsel %vm1297_vm3, %v1483_v32, 0 }
 0x1c0   : > { %v1093_v38 = vpop.f32.mrf.mxu0  ;;  %v1239_v41 = vadd.f32 %v1235_v34, %v360_v30 }
 0x1c1   : > { %v1139_v39 = vpop.f32.mrf.mxu1  ;;  %v1242_v40 = vsel %vm1049_vm2, %v1238_v37, -inf }
 0x1c2   : > { %1243 = vmax.xlane.f32.xlu0 %v1242_v40  ;;  %v2224_v43 = vpop.f32.mrf.mxu0  ;;  %v1245_v48 = vsel %vm1049_vm2, %v1239_v41, -inf  ;;  %v1484_v39 = vld [vmem:[%s2980_s5 + $0x4] sm:$0xf] }
 0x1c3   : > { %v2230_v42 = vpop.f32.mrf.mxu1  ;;  %v1537_v40 = vsel %vm1297_vm3, %v1484_v39, 0 }
 0x1c4   : > { %v1182_v44 = vpop.f32.mrf.mxu0 }
 0x1c5   : > { %v1228_v45 = vpop.f32.mrf.mxu1  ;;  %v1236_v46 = vmul.f32 0.35355338, %v1182_v44 }
 0x1c6   : > { %v1237_v47 = vmul.f32 0.35355338, %v1228_v45  ;;  %1246 = vmax.xlane.f32.xlu0 %v1245_v48  ;;  %v2235_v50 = vpop.f32.mrf.mxu0 }
 0x1c7   : > { %v2241_v49 = vpop.f32.mrf.mxu1  ;;  %v1240_v51 = vadd.f32 %v1236_v46, %v360_v30  ;;  %v1486_v46 = vld [vmem:[%s2980_s5 + $0xc] sm:$0xf] }
 0x1c8   : > { %v1185_v52 = vpop.f32.mrf.mxu0  ;;  %v1241_v55 = vadd.f32 %v1237_v47, %v360_v30  ;;  %v1629_v50 = vsel %vm1297_vm3, %v1486_v46, 0 }
 0x1c9   : > { %v1231_v53 = vpop.f32.mrf.mxu1  ;;  %v1248_v54 = vsel %vm1049_vm2, %v1240_v51, -inf }
 0x1ca   : > { %1249 = vmax.xlane.f32.xlu1 %v1248_v54  ;;  %v2236_v57 = vpop.f32.mrf.mxu0  ;;  %v1251_v58 = vsel %vm1049_vm2, %v1241_v55, -inf }
 0x1cb   : > { %v2242_v56 = vpop.f32.mrf.mxu1 }
 0x1ce   : > { %1252 = vmax.xlane.f32.xlu1 %v1251_v58 }
 0x24b   : > { %v1244_v59 = vpop.xlane.xlu0 %1243 }
 0x24c   : > { %v1254_v60 = vsub.f32 %v1238_v37, %v1244_v59 }
 0x24e   : > { %v1258_v61 = vmul.f32 1.442695, %v1254_v60 }
 0x24f   : > { %v1247_v62 = vpop.xlane.xlu0 %1246 }
 0x250   : > { %2389 = vpow2.f32 %v1258_v61  ;;  %v1255_v63 = vsub.f32 %v1239_v41, %v1247_v62  ;;  %v1485_v41 = vld [vmem:[%s2980_s5 + $0x8] sm:$0xf] }
 0x251   : > { %v1583_v44 = vsel %vm1297_vm3, %v1485_v41, 0 }
 0x252   : > { %v1260_v0 = vmul.f32 1.442695, %v1255_v63 }
 0x253   : > { %v1250_v2 = vpop.xlane.xlu1 %1249 }
 0x254   : > { %2391 = vpow2.f32 %v1260_v0  ;;  %v1256_v3 = vsub.f32 %v1240_v51, %v1250_v2 }
 0x256   : > { %v1262_v4 = vmul.f32 1.442695, %v1256_v3 }
 0x257   : > { %v1253_v5 = vpop.xlane.xlu1 %1252 }
 0x258   : > { %2393 = vpow2.f32 %v1262_v4  ;;  %v1257_v6 = vsub.f32 %v1241_v55, %v1253_v5 }
 0x25a   : > { %v1264_v8 = vmul.f32 1.442695, %v1257_v6 }
 0x25c   : > { %2395 = vpow2.f32 %v1264_v8 }
 0x25d   : > { %v2390_v9 = vpop.eup %2389 }
 0x25e   : > { %v1266_v10 = vsel %vm1049_vm2, %v2390_v9, 0.0 }
 0x25f   : > { %1267 = vadd.xlane.f32.xlu0 %v1266_v10 }
 0x261   : > { %v2392_v11 = vpop.eup %2391 }
 0x262   : > { %v1269_v12 = vsel %vm1049_vm2, %v2392_v11, 0.0 }
 0x263   : > { %1270 = vadd.xlane.f32.xlu1 %v1269_v12 }
 0x265   : > { %v2394_v13 = vpop.eup %2393 }
 0x266   : > { %v1272_v14 = vsel %vm1049_vm2, %v2394_v13, 0.0 }
 0x267   : > { %1273 = vadd.xlane.f32.xlu0 %v1272_v14 }
 0x269   : > { %v2396_v15 = vpop.eup %2395 }
 0x26a   : > { %v1275_v16 = vsel %vm1049_vm2, %v2396_v15, 0.0 }
 0x26b   : > { %1276 = vadd.xlane.f32.xlu1 %v1275_v16 }
 0x2e8   : > { %v1268_v17 = vpop.xlane.xlu0 %1267 }
 0x2e9   : > { %2397 = vrcp.f32 %v1268_v17 }
 0x2ec   : > { %v1271_v18 = vpop.xlane.xlu1 %1270 }
 0x2ed   : > { %2399 = vrcp.f32 %v1271_v18 }
 0x2f0   : > { %v1274_v19 = vpop.xlane.xlu0 %1273 }
 0x2f1   : > { %2401 = vrcp.f32 %v1274_v19 }
 0x2f4   : > { %v1277_v21 = vpop.xlane.xlu1 %1276 }
 0x2f5   : > { %2403 = vrcp.f32 %v1277_v21 }
 0x2f6   : > { %v2398_v22 = vpop.eup %2397 }
 0x2f7   : > { %v1282_v25 = vmul.f32 %v2398_v22, %v2390_v9 }
 0x2f9   : > { %v1290_v26 = vpack.c.bf16 %v1282_v25, %v1282_v25  ;;  %1286 = vst.msk [vmem:[%s2815_s23] sm:$0xff] %vm1049_vm2, %v1282_v25 }
 0x2fa   : > { %v2400_v27 = vpop.eup %2399 }
 0x2fb   : > { %2246 = vmatmul.mubr.msk.bf16.vlgmr.msra.gmra.mxu0 %vm1049_vm2, %v1290_v26  ;;  %v1283_v30 = vmul.f32 %v2400_v27, %v2392_v11 }
 0x2fc   : > { %2256 = vmatpush3.bf16.msra.mxu0 %v1391_v28  ;;  %2257 = vmatprep.mubr.msk.bf16.mxu0 %vm2502_vm0, %v2501_v1 }
 0x2fd   : > { %v1291_v20 = vpack.c.bf16 %v1283_v30, %v1283_v30  ;;  %2267 = vmatprep.subr.bf16.mxu0 %v2501_v1  ;;  %1287 = vst.msk [vmem:[%s2815_s23 + $0x8] sm:$0xff] %vm1049_vm2, %v1283_v30 }
 0x2fe   : > { %v2402_v31 = vpop.eup %2401 }
 0x2ff   : > { %2252 = vmatmul.mubr.msk.bf16.vlgmr.msra.gmra.mxu1 %vm1049_vm2, %v1291_v20  ;;  %v1284_v33 = vmul.f32 %v2402_v31, %v2394_v13 }
 0x300   : > { %2262 = vmatpush3.bf16.msra.mxu1 %v1437_v24  ;;  %2263 = vmatprep.mubr.msk.bf16.mxu1 %vm2502_vm0, %v2501_v1 }
 0x301   : > { %v1292_v34 = vpack.c.bf16 %v1284_v33, %v1284_v33  ;;  %2273 = vmatprep.subr.bf16.mxu1 %v2501_v1  ;;  %1288 = vst.msk [vmem:[%s2815_s23 + $0x10] sm:$0xff] %vm1049_vm2, %v1284_v33  ;;  %v2383_v33 = vld [vmem:[%s2981_s6 + $0x8] sm:$0xff]  }
 0x302   : > { %v2404_v36 = vpop.eup %2403 }
 0x303   : > { %2258 = vmatmul.mubr.msk.bf16.vlgmr.msra.gmra.mxu0 %vm1049_vm2, %v1292_v34  ;;  %v1285_v37 = vmul.f32 %v2404_v36, %v2396_v15  ;;  %v2385_v34 = vld [vmem:[%s2982_s7 + $0x18] sm:$0xff]   ;;  %v2387_v36 = vld [vmem:[%s2982_s7 + $0x8] sm:$0xff]  }
 0x304   : > { %2268 = vmatpush3.bf16.msra.mxu0 %v1491_v35  ;;  %2269 = vmatprep.mubr.msk.bf16.mxu0 %vm2502_vm0, %v2501_v1  ;;  %v2386_v35 = vld [vmem:[%s2982_s7 + $0x10] sm:$0xff]  }
 0x305   : > { %v1293_v38 = vpack.c.bf16 %v1285_v37, %v1285_v37  ;;  %2279 = vmatprep.subr.bf16.mxu0 %v2501_v1  ;;  %1289 = vst.msk [vmem:[%s2815_s23 + $0x18] sm:$0xff] %vm1049_vm2, %v1285_v37  ;;  %s2415_s23 = scalar_lea.vmem %s2414_s21, 1024 }
 0x306   : > { %p2417_p1 = scmp.lt.s32.totalorder %s2415_s23, %s2409_s16 }
 0x307   : > { %2264 = vmatmul.mubr.msk.bf16.vlgmr.msra.gmra.mxu1 %vm1049_vm2, %v1293_v38 }
 0x308   : > { %2275 = vmatprep.mubr.msk.bf16.mxu1 %vm2502_vm0, %v2501_v1  ;;  %2274 = vmatpush3.bf16.msra.mxu1 %v1537_v40  ;;  %p2418_p2 = por %p2417_p1, %p2416_p0 }
 0x309   : > { %2285 = vmatprep.subr.bf16.mxu1 %v2501_v1 }
 0x30a   : > { %p2419_p3 = pnand %p2418_p2, %p2412_p13 }
 0x3bb   : > { %v1335_v42 = vpop.f32.mrf.mxu0 }
 0x3bc   : > { %v1479_v43 = vpack.c.bf16 %v1335_v42, %v1335_v42 }
 0x3bd   : > { %v2247_v45 = vpop.f32.mrf.mxu0 }
 0x3be   : > { %2270 = vmatmul.mubr.msk.bf16.vlgmr.msra.gmra.mxu0 %vm1049_vm2, %v1479_v43  ;;  %v2388_v43 = vld [vmem:[%s2982_s7] sm:$0xff]  }
 0x3bf   : > { %v1338_v47 = vpop.f32.mrf.mxu0  ;;  %v1381_v48 = vpop.f32.mrf.mxu1  ;;  %2280 = vmatpush3.bf16.msra.mxu0 %v1583_v44  ;;  %2281 = vmatprep.mubr.msk.bf16.mxu0 %vm2502_vm0, %v2501_v1 }
 0x3c0   : > { %v1480_v49 = vpack.c.bf16 %v1381_v48, %v1381_v48  ;;  %2291 = vmatprep.subr.bf16.mxu0 %v2501_v1 }
 0x3c1   : > { %v2248_v51 = vpop.f32.mrf.mxu0  ;;  %v2253_v52 = vpop.f32.mrf.mxu1 }
 0x3c2   : > { %2276 = vmatmul.mubr.msk.bf16.vlgmr.msra.gmra.mxu1 %vm1049_vm2, %v1480_v49 }
 0x3c3   : > { %v1384_v53 = vpop.f32.mrf.mxu1  ;;  %v1427_v54 = vpop.f32.mrf.mxu0  ;;  %2286 = vmatpush3.bf16.msra.mxu1 %v1629_v50  ;;  %2287 = vmatprep.mubr.msk.bf16.mxu1 %vm2502_vm0, %v2501_v1 }
 0x3c4   : > { %v1481_v55 = vpack.c.bf16 %v1427_v54, %v1427_v54  ;;  %2299 = vmatprep.subr.bf16.mxu1 %v2501_v1 }
 0x3c5   : > { %v2254_v56 = vpop.f32.mrf.mxu1  ;;  %v2259_v57 = vpop.f32.mrf.mxu0 }
 0x3c6   : > { %2282 = vmatmul.mubr.msk.bf16.vlgmr.msra.gmra.mxu0 %vm1049_vm2, %v1481_v55 }
 0x3c7   : > { %v1430_v58 = vpop.f32.mrf.mxu0  ;;  %v1473_v59 = vpop.f32.mrf.mxu1  ;;  %2295 = vmatprep.mubr.msk.bf16.mxu0 %vm2502_vm0, %v2501_v1  ;;  %2292 = vmatpush3.bf16.msra.mxu0 %v2383_v33 }
 0x3c8   : > { %v1482_v60 = vpack.c.bf16 %v1473_v59, %v1473_v59  ;;  %2293 = vmatprep.subr.bf16.mxu0 %v2501_v1 }
 0x3c9   : > { %v2260_v61 = vpop.f32.mrf.mxu0  ;;  %v2265_v62 = vpop.f32.mrf.mxu1 }
 0x3ca   : > { %2288 = vmatmul.mubr.msk.bf16.vlgmr.msra.gmra.mxu1 %vm1049_vm2, %v1482_v60 }
 0x3cb   : > { %v1476_v63 = vpop.f32.mrf.mxu1  ;;  %2307 = vmatprep.mubr.msk.bf16.mxu1 %vm2502_vm0, %v2501_v1  ;;  %2300 = vmatpush3.bf16.msra.mxu1 %v2385_v34 }
 0x3cc   : > { %2301 = vmatprep.subr.bf16.mxu1 %v2501_v1 }
 0x3cd   : > { %v2266_v0 = vpop.f32.mrf.mxu1 }
 0x3cf   : > { %2302 = vmatpush3.bf16.msra.mxu1 %v2386_v35 }
 0x3d0   : > { %2303 = vmatprep.subr.bf16.mxu1 %v2501_v1 }
 0x3d3   : > { %2304 = vmatpush3.bf16.msra.mxu1 %v2387_v36 }
 0x3d4   : > { %2305 = vmatprep.subr.bf16.mxu1 %v2501_v1 }
 0x3d7   : > { %2306 = vmatpush3.bf16.msra.mxu1 %v2388_v43 }
 0x47e   : > { %v1527_v2 = vpop.f32.mrf.mxu0 }
 0x47f   : > { %v1671_v12 = vsel %vm389_vm1, %v1527_v2, 0.0 }
 0x480   : > { %v2271_v3 = vpop.f32.mrf.mxu0 }
 0x482   : > { %v1530_v4 = vpop.f32.mrf.mxu0  ;;  %v1573_v5 = vpop.f32.mrf.mxu1 }
 0x483   : > { %v1672_v9 = vsel %vm389_vm1, %v1573_v5, 0.0 }
 0x484   : > { %v2272_v6 = vpop.f32.mrf.mxu0  ;;  %v2277_v8 = vpop.f32.mrf.mxu1  ;;  %v1673_v14 = vadd.f32 %v1672_v9, %v1671_v12 }
 0x486   : > { %v1576_v10 = vpop.f32.mrf.mxu1  ;;  %v1619_v11 = vpop.f32.mrf.mxu0 }
 0x487   : > { %v1674_v13 = vsel %vm389_vm1, %v1619_v11, 0.0 }
 0x488   : > { %v2278_v15 = vpop.f32.mrf.mxu1  ;;  %v2283_v16 = vpop.f32.mrf.mxu0  ;;  %v1675_v17 = vadd.f32 %v1674_v13, %v1673_v14 }
 0x48a   : > { %v1622_v18 = vpop.f32.mrf.mxu0  ;;  %v1665_v19 = vpop.f32.mrf.mxu1 }
 0x48b   : > { %v1676_v21 = vsel %vm389_vm1, %v1665_v19, 0.0 }
 0x48c   : > { %v1677_v22 = vadd.f32 %v1676_v21, %v1675_v17  ;;  %v2284_v23 = vpop.f32.mrf.mxu0  ;;  %v2289_v25 = vpop.f32.mrf.mxu1 }
 0x48e   : > { %v1668_v26 = vpop.f32.mrf.mxu1  ;;  %v1678_v27 = vadd.f32 %v1677_v22, %v2640_v7  ;;  %v2384_v7 = vld [vmem:[%s2981_s6] sm:$0xff]  }
 0x48f   : > { %2294 = vmatpush3.bf16.msra.mxu0 %v2384_v7 }
 0x490   : > { %v2290_v28 = vpop.f32.mrf.mxu1  ;;  %v1679_v29 = vsel %vm389_vm1, %v1678_v27, 0.0 }
 0x491   : > { %1680 = vadd.xlane.f32.xlu0 %v1679_v29 }
 0x51a   : > { %v1681_v30 = vpop.xlane.xlu0 %1680 }
 0x51b   : > { %v1683_v20 = vmul.f32 0.03125, %v1681_v30 }
 0x51d   : > { %v1684_v31 = vsub.f32 %v1678_v27, %v1683_v20 }
 0x51f   : > { %v1685_v32 = vmul.f32 %v1684_v31, %v1684_v31 }
 0x521   : > { %v1686_v24 = vsel %vm389_vm1, %v1685_v32, 0.0 }
 0x522   : > { %1687 = vadd.xlane.f32.xlu1 %v1686_v24 }
 0x5ab   : > { %v1688_v37 = vpop.xlane.xlu1 %1687 }
 0x5ac   : > { %v1689_v38 = vmul.f32 0.03125, %v1688_v37 }
 0x5ae   : > { %v1690_v39 = vadd.f32 1e-05, %v1689_v38 }
 0x5b0   : > { %2405 = vrsqrt.f32 %v1690_v39 }
 0x5bd   : > { %v2406_v40 = vpop.eup %2405 }
 0x5be   : > { %v1692_v41 = vmul.f32 %v2406_v40, %v1684_v31 }
 0x5c0   : > { %v1693_v42 = vpack.c.bf16 %v1692_v41, %v1692_v41 }
 0x5c2   : > { %2296 = vmatmul.mubr.msk.bf16.vlgmr.msra.gmra.mxu0 %vm389_vm1, %v1693_v42 }
 0x682   : > { %v1747_v44 = vpop.f32.mrf.mxu0 }
 0x683   : > { %v1753_v45 = vmax.f32 %v1747_v44, 0.0 }
 0x684   : > { %v2297_v46 = vpop.f32.mrf.mxu0 }
 0x685   : > { %v1754_v47 = vpack.c.bf16 %v1753_v45, %v1753_v45 }
 0x686   : > { %v1750_v1 = vpop.f32.mrf.mxu0 }
 0x687   : > { %2308 = vmatmul.mubr.msk.bf16.vlgmr.msra.gmra.mxu1 %vm1787_vm4, %v1754_v47 }
 0x688   : > { %v2298_v48 = vpop.f32.mrf.mxu0 }
 0x747   : > { %v1825_v49 = vpop.f32.mrf.mxu1 }
 0x748   : > { %v1826_v50 = vadd.f32 %v1825_v49, %v1692_v41 }
 0x749   : > { %v2309_v51 = vpop.f32.mrf.mxu1 }
 0x74a   : > { %v1831_v52 = vsel %vm389_vm1, %v1826_v50, 0.0 }
 0x74b   : > { %1832 = vadd.xlane.f32.xlu0 %v1831_v52  ;;  %v1828_v53 = vpop.f32.mrf.mxu1 }
 0x74d   : > { %v2310_v54 = vpop.f32.mrf.mxu1 }
 0x7d4   : > { %v1833_v55 = vpop.xlane.xlu0 %1832 }
 0x7d5   : > { %v1834_v56 = vmul.f32 0.03125, %v1833_v55 }
 0x7d7   : > { %v1835_v57 = vsub.f32 %v1826_v50, %v1834_v56 }
 0x7d9   : > { %v1836_v58 = vmul.f32 %v1835_v57, %v1835_v57 }
 0x7db   : > { %v1837_v59 = vsel %vm389_vm1, %v1836_v58, 0.0 }
 0x7dc   : > { %1838 = vadd.xlane.f32.xlu1 %v1837_v59 }
 0x7dd   : > { %2422 = shalt.err (!%p2419_p3)
}
 0x7de   : > { %s2423_s22 = scalar_lea.hbm %s2914_s28, 512  ;;  %s2427_s27 = scalar_lea.hbm %s2984_s9, 1024 }
 0x7df   : > { %p2424_p4 = scmp.ne.s32.totalorder %s2914_s28, %s2423_s22  ;;  %p2428_p9 = scmp.lt.s32.totalorder %s2914_s28, %s2984_s9 }
 0x7e0   : > { %p2429_p10 = scmp.lt.s32.totalorder %s2427_s27, %s2423_s22 }
 0x7e1   : > { %p2425_p7 = pnand %p2424_p4, %p2595_p5 }
 0x7e2   : > { %p2430_p11 = por %p2429_p10, %p2428_p9 }
 0x7e3   : > { %p2426_p8 = pneg %p2425_p7 }
 0x7e5   : > { %p2431_p12 = pnand %p2430_p11, %p2426_p8 }
 0x7e7   : > { %2434 = shalt.err (!%p2431_p12)
}
 0x7e8   : > { %s2504_s16 = smov 128   ;;  %s2505_s21 = smov 8  }
 0x7e9   : > { %s2991_s23 = scalar_lea.sflag [#allocation5], %s2810_s29  ;;  %s1987_s14 = sshll.u32 %s2810_s29, 3 }
 0x7ea   : > { %2312 = dma.vmem_to_hbm [thread:$0]  (%p2595_p5), %s2909_s24, 512, %s2914_s28, %s2991_s23, %s2504_s16, %s2504_s16, %s2505_s21  }
 0x7eb   : > { %s2049_s22 = sshll.u32 %s2578_s13, 7  ;;  %s340_s25 = scalar_lea.vmem [#allocation2], %s1987_s14 }
 0x7ec   : > { %s1864_s26 = sshll.u32 %s340_s25, 4  ;;  %s1862_s0 = scalar_lea.hbm %s2983_s8, %s2049_s22  ;;  %s1865_s26 = int_to_ptr.vmem [resolvable:$true] %s1864_s26 }
 0x7ed   : > { %s1846_s1 = scalar_lea.sflag [#allocation3], %s2810_s29  ;;  %s2435_s24 = scalar_lea.vmem %s1865_s26, 128 }
 0x7ee   : > { %p2436_p13 = scmp.ne.s32.totalorder %s1865_s26, %s2435_s24  ;;  %s2506_s28 = smov [#allocation2]  }
 0x7ef   : > { %s2439_s16 = sshll.u32 %s2506_s28, 4  ;;  %s2440_s16 = int_to_ptr.vmem [resolvable:$false] %s2439_s16 }
 0x7f0   : > { %p2437_p0 = pnand %p2436_p13, %p2595_p5  ;;  %s2441_s13 = scalar_lea.vmem %s2440_s16, 256 }
 0x7f1   : > { %p2442_p2 = scmp.lt.s32.totalorder %s1865_s26, %s2440_s16  ;;  %p2443_p3 = scmp.lt.s32.totalorder %s2441_s13, %s2435_s24 }
 0x7f2   : > { %p2438_p1 = pneg %p2437_p0 }
 0x7f3   : > { %p2444_p4 = por %p2443_p3, %p2442_p2 }
 0x7f5   : > { %p2445_p7 = pnand %p2444_p4, %p2438_p1 }
 0x865   : > { %v1839_v60 = vpop.xlane.xlu1 %1838 }
 0x866   : > { %v1840_v61 = vmul.f32 0.03125, %v1839_v60 }
 0x868   : > { %v1841_v62 = vadd.f32 1e-05, %v1840_v61 }
 0x86a   : > { %2407 = vrsqrt.f32 %v1841_v62 }
 0x877   : > { %v2408_v63 = vpop.eup %2407 }
 0x878   : > { %v1843_v0 = vmul.f32 %v2408_v63, %v1835_v57 }
 0x87a   : > { %1844 = vst.msk [vmem:[%s340_s25] sm:$0xff] %vm389_vm1, %v1843_v0 }
 0x87b   : > { %2448 = shalt.err (!%p2445_p7)
}
 0x87c   : > { %s2449_s21 = scalar_lea.hbm %s1862_s0, 128  ;;  %s2453_s14 = scalar_lea.hbm %s2983_s8, 256 }
 0x87d   : > { %p2450_p8 = scmp.ne.s32.totalorder %s1862_s0, %s2449_s21  ;;  %p2454_p11 = scmp.lt.s32.totalorder %s1862_s0, %s2983_s8 }
 0x87e   : > { %p2455_p12 = scmp.lt.s32.totalorder %s2453_s14, %s2449_s21 }
 0x87f   : > { %p2451_p9 = pnand %p2450_p8, %p2595_p5 }
 0x880   : > { %p2456_p13 = por %p2455_p12, %p2454_p11 }
 0x881   : > { %p2452_p10 = pneg %p2451_p9 }
 0x883   : > { %p2457_p0 = pnand %p2456_p13, %p2452_p10 }
 0x885   : > { %2460 = shalt.err (!%p2457_p0)
}
 0x886   : > { %2311 = dma.vmem_to_hbm [thread:$0]  (%p2595_p5), %s1865_s26, 128, %s1862_s0, %s1846_s1  }
 0x887 PF: > { %p2322_p1 = scmp.ge.s32.totalorder %s2499_s12, 2  ;;  %s1892_s27 = sand.u32 1, %s2487_s30  }
 0x888   : > { %s1893_s17 = scalar_lea.sflag [#allocation3], %s1892_s27 }
 0x889   : > { %p2316_p2 = pnand %p2322_p1, %p2599_p6 }
 0x88b   : > { %p2317_p3 = pneg %p2316_p2 }
 0x88d   : > { %2478 = dma.done.wait (%p2317_p3), %s1893_s17, 128  }
 0x88e   : > { %2480 = vsyncadd (%p2317_p3), %s1893_s17, 4294967168  ;;  %s1902_s24 = scalar_lea.sflag [#allocation5], %s1892_s27 }
 0x88f   : > { %2482 = dma.done.wait (%p2317_p3), %s1902_s24, 512  }
 0x890   : > { %2484 = vsyncadd (%p2317_p3), %s1902_s24, 4294966784  ;;  %p23_p5 = scmp.ge.s32.totalorder %s2582_s15, 4   ;;  %s2992_s30 = smov %s2491_s10 }
 0x891   : > { %s2993_s10 = smov %s2495_s11  ;;  %s2994_s11 = smov %s2593_s18 }
 0x892   : > { %s2995_s12 = smov %s2582_s15  ;;  %25 = sbr.rel (!%p23_p5) target bundleno = 8 (0x8), region = 107 }
 0x897   :  { %1907 = vsyncpa [#allocation3], 1 }
 0x898   :  { %1909 = vsyncpa [#allocation3 + $0x1], 1 }
 0x899   :  { %1910 = vsyncpa [#allocation5], 1 }
 0x89a   :  { %1912 = vsyncpa [#allocation5 + $0x1], 1 }

</bundles_post_ra>
